<compile_context>
chip_gen: v6e
topology: v6e:2x2x1
jax: 0.10.0
libtpu: 0.0.40
codegen_flags: <defaults>
</compile_context>

<pallas_src>
import jax
import jax.numpy as jnp
from jax.experimental import pallas as pl
from jax.experimental.pallas import tpu as pltpu

IN_FEATURES = 250
OUT_FEATURES = 1
_MAX_TILE_B = 4096   # 4096 rows x 256 padded lanes x 4 B = 4 MiB per buffer
_MIN_TILE_B = 512


def _round8(n):
    return ((n + 7) // 8) * 8


def _pick_tile_b(batch):
    """Row-tile size: as large as possible (<= _MAX_TILE_B), sublane aligned,
    targeting an even number of grid steps to balance v7x's 2 TensorCores."""
    b8 = _round8(batch)
    if b8 <= 2 * _MIN_TILE_B:
        return b8                                  # tiny batch: single block
    pairs = pl.cdiv(b8, 2 * _MAX_TILE_B)
    tile = _round8(pl.cdiv(b8, 2 * pairs))
    return min(tile, _MAX_TILE_B)


def _linear_sigmoid_kernel(x_ref, w_ref, b_ref, o_ref):
    # x_ref: (tile_b, 250) VMEM     w_ref: (250, 1) VMEM (resident)
    # b_ref: (1,) SMEM scalar       o_ref: (tile_b, 1) VMEM
    x = x_ref[...]
    w = w_ref[...]
    # MXU matmul (MXU is otherwise idle; frees the VPU/XLU slots). HIGHEST
    # precision keeps the multi-pass f32 decomposition -> matches f32 ref.
    acc = jnp.dot(x, w, preferred_element_type=jnp.float32,
                  precision=jax.lax.Precision.HIGHEST)
    acc = acc + b_ref[0]                           # scalar bias from SMEM
    o_ref[...] = jax.nn.sigmoid(acc).astype(o_ref.dtype)


def final_layer(x, w, b):
    """x: (B, 250) f32, w: (250, 1) f32 (transposed torch weight), b: (1,) f32
    -> (B, 1) f32 == sigmoid(x @ w + b)."""
    batch = x.shape[0]
    tile_b = _pick_tile_b(batch)
    grid = (pl.cdiv(batch, tile_b),)   # partial last block handled by Pallas

    return pl.pallas_call(
        _linear_sigmoid_kernel,
        out_shape=jax.ShapeDtypeStruct((batch, OUT_FEATURES), jnp.float32),
        grid=grid,
        in_specs=[
            pl.BlockSpec((tile_b, IN_FEATURES), lambda i: (i, 0)),
            pl.BlockSpec((IN_FEATURES, OUT_FEATURES), lambda i: (0, 0)),
            pl.BlockSpec(memory_space=pltpu.MemorySpace.SMEM),
        ],
        out_specs=pl.BlockSpec((tile_b, OUT_FEATURES), lambda i: (i, 0)),
        compiler_params=pltpu.CompilerParams(
            dimension_semantics=("parallel",),
        ),
    )(x, w.reshape(IN_FEATURES, OUT_FEATURES), b.reshape(OUT_FEATURES))


def init_params(key):
    # Mimic nn.Linear(250, 1) init: U(-k, k), k = 1/sqrt(250).
    kw, kb = jax.random.split(key)
    bound = 1.0 / jnp.sqrt(jnp.float32(IN_FEATURES))
    # PyTorch weight is (out, in); we store its transpose (in, out).
    w = jax.random.uniform(kw, (IN_FEATURES, OUT_FEATURES), jnp.float32,
                           -bound, bound)
    b = jax.random.uniform(kb, (OUT_FEATURES,), jnp.float32, -bound, bound)
    return w, b


def _reference(x, w, b):
    # High-precision f32 reference (avoid XLA's reduced-precision f32 matmul).
    z = jnp.dot(x, w, precision=jax.lax.Precision.HIGHEST) + b[None, :]
    return jax.nn.sigmoid(z)


if __name__ == "__main__":
    key = jax.random.PRNGKey(0)
    kx, kp = jax.random.split(key)
    w, b = init_params(kp)

    # Small smoke test (single full block).
    B = 8
    x = jax.random.normal(kx, (B, IN_FEATURES), jnp.float32)
    out = jax.block_until_ready(final_layer(x, w, b))
    ref = _reference(x, w, b)
    assert out.shape == (B, OUT_FEATURES)
    assert jnp.allclose(out, ref, atol=1e-5, rtol=1e-5)

    # Batch that is neither a multiple of 8 nor of the tile size: exercises
    # the gridded path with a partial (masked-write) final block, no padding.
    B2 = 2597
    x2 = jax.random.normal(kx, (B2, IN_FEATURES), jnp.float32)
    out2 = jax.block_until_ready(final_layer(x2, w, b))
    ref2 = _reference(x2, w, b)
    assert out2.shape == (B2, OUT_FEATURES)
    assert jnp.allclose(out2, ref2, atol=1e-5, rtol=1e-5)

    print("KERNEL_OK")
</pallas_src>

<mosaic_0001>
module attributes {stable_mosaic.version = 11 : i64} {
  func.func @_linear_sigmoid_kernel(%arg0: i32, %arg1: memref<8x250xf32, #tpu.memory_space<vmem>>, %arg2: memref<250x1xf32, #tpu.memory_space<vmem>>, %arg3: memref<1xf32, #tpu.memory_space<smem>>, %arg4: memref<8x1xf32, #tpu.memory_space<vmem>>) attributes {dimension_semantics = [#tpu.dimension_semantics<parallel>], iteration_bounds = array<i64: 1>, scalar_prefetch = 0 : i64, scratch_operands = 0 : i64, tpu.core_type = #tpu.core_type<tc>, window_params = [{transform_indices = @transform_0, window_bounds = array<i64: 8, 250>}, {pipeline_mode = #tpu.pipeline_mode<synchronous>, transform_indices = @transform_1, window_bounds = array<i64: 250, 1>}, {transform_indices = @transform_2, window_bounds = array<i64: 1>}, {transform_indices = @transform_3, window_bounds = array<i64: 8, 1>}]} {
    %c0 = arith.constant 0 : index
    %c0_0 = arith.constant 0 : index
    %0 = vector.load %arg1[%c0, %c0_0] : memref<8x250xf32, #tpu.memory_space<vmem>>, vector<8x250xf32>
    %c0_1 = arith.constant 0 : index
    %c0_2 = arith.constant 0 : index
    %1 = vector.load %arg2[%c0_1, %c0_2] : memref<250x1xf32, #tpu.memory_space<vmem>>, vector<250x1xf32>
    %cst = arith.constant dense<0.000000e+00> : vector<8x1xf32>
    %2 = tpu.matmul %0, %1, %cst {dimension_numbers = #tpu.dot_dimension_numbers<[1], [0], [0], [1], [0, 0, 1, 1], [], []>, precision = #tpu.contract_precision<fp32>} : vector<8x250xf32>, vector<250x1xf32>, vector<8x1xf32> -> vector<8x1xf32>
    %c0_3 = arith.constant 0 : index
    %3 = memref.load %arg3[%c0_3] : memref<1xf32, #tpu.memory_space<smem>>
    %4 = vector.broadcast %3 : f32 to vector<8x1xf32>
    %5 = arith.addf %2, %4 : vector<8x1xf32>
    %6 = arith.negf %5 : vector<8x1xf32>
    %7 = math.exp %6 : vector<8x1xf32>
    %cst_4 = arith.constant 1.000000e+00 : f32
    %8 = vector.broadcast %cst_4 : f32 to vector<8x1xf32>
    %9 = arith.addf %8, %7 : vector<8x1xf32>
    %10 = arith.divf %8, %9 : vector<8x1xf32>
    %c0_5 = arith.constant 0 : index
    %c0_6 = arith.constant 0 : index
    %11 = vector.load %arg4[%c0_5, %c0_6] : memref<8x1xf32, #tpu.memory_space<vmem>>, vector<8x1xf32>
    tpu.vector_store %arg4[%c0_5, %c0_6], %10 {strides = array<i32>} : memref<8x1xf32, #tpu.memory_space<vmem>>, vector<8x1xf32>,
    return
  }
  func.func @transform_0(%arg0: i32) -> (i32, i32) {
    %c0_i32 = arith.constant 0 : i32
    %c0_i32_0 = arith.constant 0 : i32
    return %arg0, %c0_i32 : i32, i32
  }
  func.func @transform_1(%arg0: i32) -> (i32, i32) {
    %c0_i32 = arith.constant 0 : i32
    %c0_i32_0 = arith.constant 0 : i32
    %c0_i32_1 = arith.constant 0 : i32
    return %c0_i32, %c0_i32_0 : i32, i32
  }
  func.func @transform_2(%arg0: i32) -> i32 {
    %c0_i32 = arith.constant 0 : i32
    %c0_i32_0 = arith.constant 0 : i32
    return %c0_i32 : i32
  }
  func.func @transform_3(%arg0: i32) -> (i32, i32) {
    %c0_i32 = arith.constant 0 : i32
    %c0_i32_0 = arith.constant 0 : i32
    return %arg0, %c0_i32 : i32, i32
  }
}

</mosaic_0001>

<bundles_post_ra>
// kernel: tpu_custom_call.1
= control target key start
LH: loop header
LB: loop body
LE: loop exit
PB: predicated region body
PF: predicated region fallthrough
CT: control target
= control target key end

     0   :  { %vm55_vm0 = vcmask 1041408   ;;  %vm51_vm1 = vcmask 998400   ;;  %vm927_vm2 = vcmask 7168   ;;  %s1879_s1 = inlined_call_operand.vmem [shape: f32[250,1], index: 1, kind: input, shape index: {}]   ;;  %s1880_s0 = inlined_call_operand.vmem [shape: f32[8,250], index: 0, kind: input, shape index: {}]   ;;  %s1881_s2 = inlined_call_operand.<no memory space> [shape: f32[1], index: 2, kind: input, shape index: {}]   ;;  %s1882_s3 = inlined_call_operand.vmem [shape: f32[8,1], index: 3, kind: output, shape index: {}]  }
   0x1   :  { %v48_v0 = vld [vmem:[%s1879_s1 + $0xf8] sm:$0x3]  ;;  %v47_v2 = vld [vmem:[%s1879_s1 + $0xf0] sm:$0xff]  ;;  %v46_v7 = vld [vmem:[%s1879_s1 + $0xe8] sm:$0xff] }
   0x2   :  { %v32_v1 = vld [vmem:[%s1879_s1 + $0x78] sm:$0xff]  ;;  %v57_v3 = vsel %vm55_vm0, %v48_v0, 0  ;;  %v1179_v5 = vand.u32 4294901760, %v47_v2  ;;  %v31_v6 = vld [vmem:[%s1879_s1 + $0x70] sm:$0xff]  ;;  %v30_v8 = vld [vmem:[%s1879_s1 + $0x68] sm:$0xff]  ;;  %v1194_v11 = vand.u32 4294901760, %v46_v7 }
   0x3   :  { %v1177_v4 = vand.u32 4294901760, %v32_v1  ;;  %v1190_v9 = vand.u32 4294901760, %v57_v3  ;;  %v1192_v10 = vand.u32 4294901760, %v31_v6  ;;  %v1196_v12 = vand.u32 4294901760, %v30_v8  ;;  %v45_v13 = vld [vmem:[%s1879_s1 + $0xe0] sm:$0xff]  ;;  %v44_v17 = vld [vmem:[%s1879_s1 + $0xd8] sm:$0xff] }
   0x4   :  { %v29_v14 = vld [vmem:[%s1879_s1 + $0x60] sm:$0xff]  ;;  %v1204_v15 = vand.u32 4294901760, %v45_v13  ;;  %v1214_v18 = vld [vmem:[%s1879_s1 + $0x58] sm:$0xff]  ;;  %v1222_v20 = vld [vmem:[%s1879_s1 + $0xd0] sm:$0xff]  ;;  %v1225_v21 = vsub.f32 %v47_v2, %v1179_v5  ;;  %v1228_v22 = vand.u32 4294901760, %v44_v17  ;;  %v1274_v36 = vsub.f32 %v46_v7, %v1194_v11 }
   0x5   :  { %v1206_v16 = vand.u32 4294901760, %v29_v14  ;;  %v1217_v19 = vsub.f32 %v32_v1, %v1177_v4  ;;  %934 = vmatprep.subr.mxu0 %v1190_v9  ;;  %v1231_v23 = vsub.f32 %v57_v3, %v1190_v9  ;;  %v1234_v24 = vand.u32 4294901760, %v1214_v18  ;;  %v1242_v26 = vld [vmem:[%s1879_s1 + $0x50] sm:$0xff]  ;;  %v1247_v27 = vld [vmem:[%s1879_s1 + $0xc8] sm:$0xff]  ;;  %v1266_v33 = vld [vmem:[%s1879_s1 + $0xc0] sm:$0xff] }
   0x6   :  { %v1237_v25 = vand.u32 4294901760, %v1222_v20  ;;  %v1252_v28 = vld [vmem:[%s1879_s1 + $0x48] sm:$0xff]  ;;  %935 = vmatpush3.msra.mxu0 %v1177_v4  ;;  %v1893_v30 = vand.u32 4294901760, %v1225_v21  ;;  %v1258_v31 = vand.u32 4294901760, %v1242_v26  ;;  %v1261_v32 = vsub.f32 %v31_v6, %v1192_v10  ;;  %v1293_v42 = vld [vmem:[%s1879_s1 + $0x40] sm:$0xff]  ;;  %v1309_v47 = vld [vmem:[%s1879_s1 + $0xb8] sm:$0xff] }
   0x7   :  { %1956 = vst [vmem:[#allocation3_spill] sm:$0xff] %v1231_v23  ;;  %v1895_v29 = vand.u32 4294901760, %v1217_v19  ;;  %936 = vmatprep.subr.mxu0 %v1179_v5  ;;  %v1896_v34 = vand.u32 4294901760, %v1231_v23  ;;  %v1271_v35 = vand.u32 4294901760, %v1247_v27  ;;  %v1277_v37 = vand.u32 4294901760, %v1252_v28  ;;  %v1319_v52 = vld [vmem:[%s1879_s1 + $0x38] sm:$0xff] }
   0x8   :  { %1957 = vst [vmem:[#allocation4_spill] sm:$0xff] %v1258_v31  ;;  %937 = vmatpush3.msra.mxu0 %v1192_v10  ;;  %v294_v39 = vsub.f32 %v1225_v21, %v1893_v30  ;;  %v1892_v40 = vand.u32 4294901760, %v1261_v32  ;;  %v1288_v41 = vsub.f32 %v30_v8, %v1196_v12  ;;  %v1890_v44 = vand.u32 4294901760, %v1274_v36  ;;  %v1332_v57 = vld [vmem:[%s1879_s1 + $0xb0] sm:$0xff]  ;;  %v1362_v3 = vld [vmem:[%s1879_s1 + $0xa8] sm:$0xff] }
   0x9   :  { %1958 = vst [vmem:[#allocation5_spill] sm:$0xff] %v1271_v35  ;;  %1959 = vst [vmem:[#allocation6_spill] sm:$0xff] %v1277_v37  ;;  %v175_v38 = vsub.f32 %v1217_v19, %v1895_v29  ;;  %938 = vmatprep.subr.mxu0 %v1194_v11  ;;  %v287_v43 = vsub.f32 %v1231_v23, %v1896_v34  ;;  %v1301_v45 = vand.u32 4294901760, %v1266_v33  ;;  %v1327_v56 = vand.u32 4294901760, %v1293_v42  ;;  %v1347_v62 = vld [vmem:[%s1879_s1 + $0x30] sm:$0xff]  ;;  %v1498_v29 = vld [vmem:[%s1879_s1 + $0x88] sm:$0xff] }
   0xa   :  { %v1304_v46 = vsub.f32 %v45_v13, %v1204_v15  ;;  %939 = vmatpush3.msra.mxu0 %v1196_v12  ;;  %v295_v49 = vand.u32 4294901760, %v294_v39  ;;  %v182_v50 = vsub.f32 %v1261_v32, %v1892_v40  ;;  %v1888_v51 = vand.u32 4294901760, %v1288_v41 }
   0xb   :  { %1960 = vst [vmem:[#allocation7_spill] sm:$0xff] %v1301_v45  ;;  %v176_v48 = vand.u32 4294901760, %v175_v38  ;;  %940 = vmatprep.subr.mxu0 %v1204_v15  ;;  %v288_v53 = vand.u32 4294901760, %v287_v43  ;;  %v301_v54 = vsub.f32 %v1274_v36, %v1890_v44  ;;  %1961 = vst [vmem:[#allocation8_spill] sm:$0xff] %v1327_v56  ;;  %v1339_v60 = vsub.f32 %v29_v14, %v1206_v16  ;;  %v1376_v14 = vld [vmem:[%s1879_s1 + $0x28] sm:$0xff]  ;;  %v1471_v44 = vld [vmem:[%s1879_s1 + $0x90] sm:$0xff] }
   0xc   :  { %v1886_v55 = vand.u32 4294901760, %v1304_v46  ;;  %941 = vmatpush3.msra.mxu0 %v1206_v16  ;;  %v183_v58 = vand.u32 4294901760, %v182_v50  ;;  %v189_v59 = vsub.f32 %v1288_v41, %v1888_v51  ;;  %v1342_v61 = vand.u32 4294901760, %v1309_v47  ;;  %v1455_v51 = vld [vmem:[%s1879_s1 + $0x18] sm:$0xff] }
   0xd   :  { %942 = vmatprep.subr.mxu0 %v1228_v22  ;;  %969 = vmatprep.subr.mxu1 %v288_v53  ;;  %v302_v63 = vand.u32 4294901760, %v301_v54  ;;  %v1354_v1 = vsub.f32 %v44_v17, %v1228_v22  ;;  %v1357_v2 = vand.u32 4294901760, %v1319_v52  ;;  %v1885_v7 = vand.u32 4294901760, %v1339_v60 }
   0xe   :  { %1962 = vst [vmem:[#allocation9_spill] sm:$0xff] %v1342_v61  ;;  %v308_v0 = vsub.f32 %v1304_v46, %v1886_v55  ;;  %943 = vmatpush3.msra.mxu0 %v1234_v24  ;;  %970 = vmatpush3.msra.mxu1 %v176_v48  ;;  %v190_v6 = vand.u32 4294901760, %v189_v59  ;;  %v1368_v8 = vsub.f32 %v1214_v18, %v1234_v24  ;;  %v1371_v13 = vand.u32 4294901760, %v1332_v57 }
   0xf   :  { %1963 = vst [vmem:[#allocation10_spill] sm:$0xff] %v1357_v2  ;;  %944 = vmatprep.subr.mxu0 %v1237_v25  ;;  %971 = vmatprep.subr.mxu1 %v295_v49  ;;  %v1883_v38 = vand.u32 4294901760, %v1354_v1  ;;  %v1382_v39 = vsub.f32 %v1222_v20, %v1237_v25  ;;  %v1385_v18 = vand.u32 4294901760, %v1347_v62  ;;  %v196_v43 = vsub.f32 %v1339_v60, %v1885_v7  ;;  %v1402_v20 = vld [vmem:[%s1879_s1 + $0xa0] sm:$0xff] }
  0x10   :  { %1964 = vst [vmem:[#allocation11_spill] sm:$0xff] %v1371_v13  ;;  %v309_v17 = vand.u32 4294901760, %v308_v0  ;;  %945 = vmatpush3.msra.mxu0 %v1258_v31  ;;  %972 = vmatpush3.msra.mxu1 %v183_v58  ;;  %v1884_v48 = vand.u32 4294901760, %v1368_v8  ;;  %v1394_v49 = vsub.f32 %v1242_v26, %v1258_v31  ;;  %v1397_v50 = vand.u32 4294901760, %v1362_v3 }
  0x11   :  { %1965 = vst [vmem:[#allocation12_spill] sm:$0xff] %v1385_v18  ;;  %946 = vmatprep.subr.mxu0 %v1271_v35  ;;  %973 = vmatprep.subr.mxu1 %v302_v63  ;;  %v315_v53 = vsub.f32 %v1354_v1, %v1883_v38  ;;  %v1887_v54 = vand.u32 4294901760, %v1382_v39  ;;  %v1411_v26 = vsub.f32 %v1247_v27, %v1271_v35  ;;  %v1414_v58 = vand.u32 4294901760, %v1376_v14  ;;  %v1428_v27 = vld [vmem:[%s1879_s1 + $0x20] sm:$0xff] }
  0x12   :  { %1966 = vst [vmem:[#allocation13_spill] sm:$0xff] %v1397_v50  ;;  %947 = vmatpush3.msra.mxu0 %v1277_v37  ;;  %974 = vmatpush3.msra.mxu1 %v190_v6  ;;  %v197_v59 = vand.u32 4294901760, %v196_v43  ;;  %v203_v63 = vsub.f32 %v1368_v8, %v1884_v48  ;;  %v1889_v0 = vand.u32 4294901760, %v1394_v49  ;;  %v1423_v38 = vsub.f32 %v1252_v28, %v1277_v37  ;;  %v1441_v28 = vld [vmem:[%s1879_s1 + $0x98] sm:$0xff] }
  0x13   :  { %1967 = vst [vmem:[#allocation14_spill] sm:$0xff] %v1414_v58  ;;  %948 = vmatprep.subr.mxu0 %v1301_v45  ;;  %975 = vmatprep.subr.mxu1 %v309_v17  ;;  %v316_v6 = vand.u32 4294901760, %v315_v53  ;;  %v322_v43 = vsub.f32 %v1382_v39, %v1887_v54  ;;  %v1891_v48 = vand.u32 4294901760, %v1411_v26  ;;  %v1436_v7 = vand.u32 4294901760, %v1402_v20 }
  0x14   :  { %949 = vmatpush3.msra.mxu0 %v1327_v56  ;;  %976 = vmatpush3.msra.mxu1 %v197_v59  ;;  %v204_v55 = vand.u32 4294901760, %v203_v63  ;;  %v210_v17 = vsub.f32 %v1394_v49, %v1889_v0  ;;  %v1894_v53 = vand.u32 4294901760, %v1423_v38  ;;  %v1450_v54 = vsub.f32 %v1266_v33, %v1301_v45  ;;  %v15_v45 = vld [vmem:[%s1880_s0] sm:$0xff] }
  0x15   :  { %1968 = vst [vmem:[#allocation15_spill] sm:$0xff] %v1436_v7  ;;  %950 = vmatprep.subr.mxu0 %v1342_v61  ;;  %977 = vmatprep.subr.mxu1 %v316_v6  ;;  %v323_v59 = vand.u32 4294901760, %v322_v43  ;;  %v329_v63 = vsub.f32 %v1411_v26, %v1891_v48  ;;  %v1462_v0 = vand.u32 4294901760, %v1428_v27  ;;  %v1466_v33 = vsub.f32 %v1293_v42, %v1327_v56  ;;  %v1484_v42 = vld [vmem:[%s1879_s1 + $0x10] sm:$0xff] }
  0x16   :  { %951 = vmatpush3.msra.mxu0 %v1357_v2  ;;  %978 = vmatpush3.msra.mxu1 %v204_v55  ;;  %v211_v6 = vand.u32 4294901760, %v210_v17  ;;  %v217_v43 = vsub.f32 %v1423_v38, %v1894_v53  ;;  %v1899_v48 = vand.u32 4294901760, %v1450_v54  ;;  %v1479_v40 = vand.u32 4294901760, %v1441_v28 }
  0x17   :  { %1969 = vst [vmem:[#allocation16_spill] sm:$0xff] %v1462_v0  ;;  %952 = vmatprep.subr.mxu0 %v1371_v13  ;;  %979 = vmatprep.subr.mxu1 %v323_v59  ;;  %v330_v30 = vand.u32 4294901760, %v329_v63  ;;  %v1900_v55 = vand.u32 4294901760, %v1466_v33  ;;  %v1490_v17 = vsub.f32 %v1309_v47, %v1342_v61  ;;  %v1493_v53 = vand.u32 4294901760, %v1455_v51 }
  0x18   :  { %953 = vmatpush3.msra.mxu0 %v1385_v18  ;;  %980 = vmatpush3.msra.mxu1 %v211_v6  ;;  %v218_v34 = vand.u32 4294901760, %v217_v43  ;;  %v336_v59 = vsub.f32 %v1450_v54, %v1899_v48  ;;  %v1506_v47 = vsub.f32 %v1319_v52, %v1357_v2  ;;  %v1509_v63 = vand.u32 4294901760, %v1471_v44  ;;  %v1526_v52 = vld [vmem:[%s1879_s1 + $0x8] sm:$0xff] }
  0x19   :  { %1970 = vst [vmem:[#allocation17_spill] sm:$0xff] %v1493_v53  ;;  %954 = vmatprep.subr.mxu0 %v1397_v50  ;;  %981 = vmatprep.subr.mxu1 %v330_v30  ;;  %v224_v61 = vsub.f32 %v1466_v33, %v1900_v55  ;;  %v1518_v43 = vsub.f32 %v1332_v57, %v1371_v13  ;;  %v1521_v48 = vand.u32 4294901760, %v1484_v42  ;;  %v1535_v57 = vand.u32 4294901760, %v1498_v29  ;;  %v1540_v13 = vld [vmem:[%s1879_s1 + $0x80] sm:$0xff] }
  0x1a   :  { %1971 = vst [vmem:[#allocation18_spill] sm:$0xff] %v1509_v63  ;;  %955 = vmatpush3.msra.mxu0 %v1414_v58  ;;  %982 = vmatpush3.msra.mxu1 %v218_v34  ;;  %v337_v30 = vand.u32 4294901760, %v336_v59  ;;  %v1532_v6 = vsub.f32 %v1347_v62, %v1385_v18  ;;  %v1975_v34 = vand.u32 4294901760, %v1490_v17  ;;  %v1549_v62 = vsub.f32 %v1362_v3, %v1397_v50  ;;  %v1566_v3 = vld [vmem:[%s1879_s1] sm:$0xff] }
  0x1b   :  { %1972 = vst [vmem:[#allocation19_spill] sm:$0xff] %v1521_v48  ;;  %1974 = vst [vmem:[#allocation21_spill] sm:$0xff] %v1535_v57  ;;  %956 = vmatprep.subr.mxu0 %v1436_v7  ;;  %v225_v2 = vand.u32 4294901760, %v224_v61  ;;  %v1917_v55 = vand.u32 4294901760, %v1518_v43  ;;  %v1977_v18 = vand.u32 4294901760, %v1506_v47  ;;  %v1557_v61 = vand.u32 4294901760, %v1526_v52 }
  0x1c   :  { %1973 = vst [vmem:[#allocation20_spill] sm:$0xff] %v1532_v6  ;;  %v343_v59 = vsub.f32 %v1490_v17, %v1975_v34  ;;  %1976 = vst [vmem:[#allocation22_spill] sm:$0xff] %v1549_v62  ;;  %983 = vmatprep.subr.mxu1 %v337_v30  ;;  %957 = vmatpush3.msra.mxu0 %v1462_v0  ;;  %v1561_v34 = vsub.f32 %v1376_v14, %v1414_v58  ;;  %v1574_v50 = vand.u32 4294901760, %v1540_v13  ;;  %v16_v14 = vld [vmem:[%s1880_s0 + $0x8] sm:$0xff] }
  0x1d   :  { %v231_v56 = vsub.f32 %v1506_v47, %v1977_v18  ;;  %984 = vmatpush3.msra.mxu1 %v225_v2  ;;  %958 = vmatprep.subr.mxu0 %v1479_v40  ;;  %v350_v18 = vsub.f32 %v1518_v43, %v1917_v55  ;;  %v1978_v2 = vand.u32 4294901760, %v1532_v6  ;;  %v1586_v55 = vsub.f32 %v1402_v20, %v1436_v7 }
  0x1e   :  { %v344_v30 = vand.u32 4294901760, %v343_v59  ;;  %959 = vmatpush3.msra.mxu0 %v1493_v53  ;;  %v1600_v37 = vsub.f32 %v1428_v27, %v1462_v0 }
  0x1f   :  { %v232_v58 = vand.u32 4294901760, %v231_v56  ;;  %v238_v59 = vsub.f32 %v1532_v6, %v1978_v2  ;;  %960 = vmatprep.subr.mxu0 %v1509_v63  ;;  %v351_v35 = vand.u32 4294901760, %v350_v18  ;;  %v1979_v56 = vand.u32 4294901760, %v1549_v62 }
  0x20   :  { %985 = vmatprep.subr.mxu1 %v344_v30  ;;  %v1596_v2 = vand.u32 4294901760, %v1566_v3  ;;  %961 = vmatpush3.msra.mxu0 %v1521_v48  ;;  %v1980_v30 = vand.u32 4294901760, %v1561_v34  ;;  %v1928_v18 = vand.u32 4294901760, %v1586_v55  ;;  %v53_v6 = vsel %vm51_vm1, %v16_v14, 0 }
  0x21   :  { %v357_v31 = vsub.f32 %v1549_v62, %v1979_v56  ;;  %986 = vmatpush3.msra.mxu1 %v232_v58  ;;  %v239_v20 = vand.u32 4294901760, %v238_v59  ;;  %962 = vmatprep.subr.mxu0 %v1535_v57  ;;  %v1931_v62 = vand.u32 4294901760, %v1600_v37  ;;  %v1610_v27 = vand.u32 4294901760, %v53_v6 }
  0x22   :  { %v245_v7 = vsub.f32 %v1561_v34, %v1980_v30  ;;  %987 = vmatprep.subr.mxu1 %v351_v35  ;;  %v1612_v58 = vand.u32 4294901760, %v15_v45  ;;  %963 = vmatpush3.msra.mxu0 %v1557_v61  ;;  %v364_v30 = vsub.f32 %v1586_v55, %v1928_v18  ;;  %v1620_v35 = vsub.f32 %v1441_v28, %v1479_v40 }
  0x23   :  { %v358_v56 = vand.u32 4294901760, %v357_v31  ;;  %1981 = vst [vmem:[#allocation23_spill] sm:$0xff] %v1610_v27  ;;  %988 = vmatpush3.msra.mxu1 %v239_v20  ;;  %v1624_v31 = vsub.f32 %v1455_v51, %v1493_v53  ;;  %964 = vmatprep.subr.mxu0 %v1574_v50  ;;  %v252_v14 = vsub.f32 %v1600_v37, %v1931_v62 }
  0x24   :  { %1982 = vst [vmem:[#allocation24_spill] sm:$0xff] %v1612_v58  ;;  %v246_v59 = vand.u32 4294901760, %v245_v7  ;;  %v1631_v7 = vsub.f32 %v53_v6, %v1610_v27  ;;  %v1634_v20 = vsub.f32 %v15_v45, %v1612_v58  ;;  %v365_v28 = vand.u32 4294901760, %v364_v30  ;;  %965 = vmatpush3.msra.mxu0 %v1596_v2  ;;  %396 = vmatprep.mubr.f32.mxu1 %v1610_v27 }
  0x25   :  { %989 = vmatprep.subr.mxu1 %v358_v56  ;;  %v1932_v51 = vand.u32 4294901760, %v1620_v35  ;;  %v1933_v56 = vand.u32 4294901760, %v1624_v31  ;;  %v1641_v18 = vsub.f32 %v1471_v44, %v1509_v63  ;;  %v253_v53 = vand.u32 4294901760, %v252_v14  ;;  %1004 = vmatprep.subr.mxu0 %v1231_v23 }
  0x26   :  { %990 = vmatpush3.msra.mxu1 %v246_v59  ;;  %v1940_v62 = vand.u32 4294901760, %v1631_v7  ;;  %v1941_v45 = vand.u32 4294901760, %v1634_v20  ;;  %v1648_v6 = vsub.f32 %v1484_v42, %v1521_v48  ;;  %v1660_v14 = vsub.f32 %v1498_v29, %v1535_v57 }
  0x27   :  { %991 = vmatprep.subr.mxu1 %v365_v28  ;;  %v371_v59 = vsub.f32 %v1620_v35, %v1932_v51  ;;  %v259_v44 = vsub.f32 %v1624_v31, %v1933_v56  ;;  %v1671_v56 = vsub.f32 %v1526_v52, %v1557_v61  ;;  %v1984_v29 = vand.u32 4294901760, %v1641_v18 }
  0x28   :  { %992 = vmatpush3.msra.mxu1 %v253_v53  ;;  %v158_v42 = vsub.f32 %v1631_v7, %v1940_v62  ;;  %v164_v28 = vsub.f32 %v1634_v20, %v1941_v45  ;;  %v1949_v51 = vand.u32 4294901760, %v1648_v6  ;;  %v1948_v57 = vand.u32 4294901760, %v1660_v14 }
  0x29   :  { %1983 = vst [vmem:[#allocation25_spill] sm:$0xff] %v1671_v56  ;;  %v372_v30 = vand.u32 4294901760, %v371_v59  ;;  %v260_v27 = vand.u32 4294901760, %v259_v44  ;;  %v378_v53 = vsub.f32 %v1641_v18, %v1984_v29  ;;  %v1947_v63 = vand.u32 4294901760, %v1671_v56 }
  0x2a   :  { %v159_v48 = vand.u32 4294901760, %v158_v42  ;;  %v165_v62 = vand.u32 4294901760, %v164_v28  ;;  %v266_v45 = vsub.f32 %v1648_v6, %v1949_v51  ;;  %v385_v52 = vsub.f32 %v1660_v14, %v1948_v57  ;;  %v2001_v57 = vld [vmem:[#allocation3_spill] sm:$0xff] }
  0x2b   :  { %993 = vmatprep.subr.mxu1 %v372_v30  ;;  %v379_v23 = vand.u32 4294901760, %v378_v53  ;;  %v1686_v59 = vsub.f32 %v1540_v13, %v1574_v50  ;;  %v1690_v44 = vsub.f32 %v1566_v3, %v1596_v2  ;;  %v273_v30 = vsub.f32 %v1671_v56, %v1947_v63  ;;  %v2000_v63 = vld [vmem:[#allocation15_spill] sm:$0xff] }
  0x2c   :  { %160 = vmatprep.mubr.f32.mxu0 %v159_v48  ;;  %994 = vmatpush3.msra.mxu1 %v260_v27  ;;  %v267_v42 = vand.u32 4294901760, %v266_v45  ;;  %v386_v28 = vand.u32 4294901760, %v385_v52  ;;  %v1987_v27 = vld [vmem:[#allocation20_spill] sm:$0xff]  ;;  %v1989_v52 = vld [vmem:[#allocation22_spill] sm:$0xff]  ;;  %v2002_v51 = vand.u32 4294901760, %v2001_v57  ;;  %v2010_v57 = vand.u32 4294901760, %v1274_v36 }
  0x2d   :  { %1985 = vst [vmem:[#allocation26_spill] sm:$0xff] %v1686_v59  ;;  %1986 = vst [vmem:[#allocation27_spill] sm:$0xff] %v1690_v44  ;;  %166 = vmatmul.mubr.f32.vlgmr.msra.gmra.mxu0 %v165_v62  ;;  %995 = vmatprep.subr.mxu1 %v379_v23  ;;  %v1946_v29 = vand.u32 4294901760, %v1686_v59  ;;  %v1945_v53 = vand.u32 4294901760, %v1690_v44  ;;  %v274_v13 = vand.u32 4294901760, %v273_v30  ;;  %v1988_v45 = vld [vmem:[#allocation4_spill] sm:$0xff] }
  0x2e   :  { %1005 = vmatpush3.msra.mxu0 %v1217_v19  ;;  %996 = vmatpush3.msra.mxu1 %v267_v42  ;;  %v1990_v42 = vld [vmem:[#allocation5_spill] sm:$0xff]  ;;  %v1991_v30 = vld [vmem:[#allocation6_spill] sm:$0xff] }
  0x2f   :  { %1006 = vmatprep.subr.mxu0 %v1225_v21  ;;  %997 = vmatprep.subr.mxu1 %v386_v28  ;;  %v392_v48 = vsub.f32 %v1686_v59, %v1946_v29  ;;  %v280_v23 = vsub.f32 %v1690_v44, %v1945_v53  ;;  %v1992_v28 = vld [vmem:[#allocation7_spill] sm:$0xff]  ;;  %v1998_v53 = vld [vmem:[#allocation13_spill] sm:$0xff]  ;;  %v1999_v29 = vld [vmem:[#allocation14_spill] sm:$0xff] }
  0x30   :  { %1007 = vmatpush3.msra.mxu0 %v1261_v32  ;;  %998 = vmatpush3.msra.mxu1 %v274_v13  ;;  %v1993_v13 = vld [vmem:[#allocation8_spill] sm:$0xff] }
  0x31   :  { %1008 = vmatprep.subr.mxu0 %v1274_v36  ;;  %v393_v62 = vand.u32 4294901760, %v392_v48  ;;  %v281_v3 = vand.u32 4294901760, %v280_v23  ;;  %533 = vmatprep.mubr.f32.mxu0 %v1631_v7  ;;  %v1994_v48 = vld [vmem:[#allocation9_spill] sm:$0xff]  ;;  %v1995_v23 = vld [vmem:[#allocation10_spill] sm:$0xff]  ;;  %v2015_v36 = vand.u32 4294901760, %v1634_v20 }
  0x32   :  { %1009 = vmatpush3.msra.mxu0 %v1288_v41 }
  0x33   :  { %999 = vmatprep.subr.mxu1 %v393_v62  ;;  %1010 = vmatprep.subr.mxu0 %v1304_v46  ;;  %v1996_v62 = vld [vmem:[#allocation11_spill] sm:$0xff] }
  0x34   :  { %1000 = vmatpush3.msra.mxu1 %v281_v3  ;;  %1011 = vmatpush3.msra.mxu0 %v1339_v60  ;;  %v1997_v3 = vld [vmem:[#allocation12_spill] sm:$0xff] }
  0x35   :  { %398 = vmatmul.mubr.f32.vlgmr.msra.gmra.mxu1 %v1612_v58  ;;  %1012 = vmatprep.subr.mxu0 %v1354_v1  ;;  %v2003_v58 = vld [vmem:[#allocation17_spill] sm:$0xff] }
  0x36   :  { %1039 = vmatprep.subr.mxu1 %v1190_v9  ;;  %1013 = vmatpush3.msra.mxu0 %v1368_v8 }
  0x37   :  { %1040 = vmatpush3.msra.mxu1 %v1177_v4  ;;  %1014 = vmatprep.subr.mxu0 %v1382_v39 }
  0x38   :  { %1041 = vmatprep.subr.mxu1 %v1179_v5  ;;  %1015 = vmatpush3.msra.mxu0 %v1394_v49 }
  0x39   :  { %1042 = vmatpush3.msra.mxu1 %v1192_v10  ;;  %1016 = vmatprep.subr.mxu0 %v1411_v26 }
  0x3a   :  { %1043 = vmatprep.subr.mxu1 %v1194_v11  ;;  %1017 = vmatpush3.msra.mxu0 %v1423_v38 }
  0x3b   :  { %1044 = vmatpush3.msra.mxu1 %v1196_v12  ;;  %1018 = vmatprep.subr.mxu0 %v1450_v54 }
  0x3c   :  { %1045 = vmatprep.subr.mxu1 %v1204_v15  ;;  %1019 = vmatpush3.msra.mxu0 %v1466_v33 }
  0x3d   :  { %1046 = vmatpush3.msra.mxu1 %v1206_v16  ;;  %1020 = vmatprep.subr.mxu0 %v1490_v17 }
  0x3e   :  { %1047 = vmatprep.subr.mxu1 %v1228_v22  ;;  %1021 = vmatpush3.msra.mxu0 %v1506_v47 }
  0x3f   :  { %1048 = vmatpush3.msra.mxu1 %v1234_v24  ;;  %1022 = vmatprep.subr.mxu0 %v1518_v43 }
  0x40   :  { %1049 = vmatprep.subr.mxu1 %v1237_v25  ;;  %1023 = vmatpush3.msra.mxu0 %v1987_v27 }
  0x41   :  { %1050 = vmatpush3.msra.mxu1 %v1988_v45  ;;  %1024 = vmatprep.subr.mxu0 %v1989_v52 }
  0x42   :  { %1051 = vmatprep.subr.mxu1 %v1990_v42  ;;  %1025 = vmatpush3.msra.mxu0 %v1561_v34 }
  0x43   :  { %1052 = vmatpush3.msra.mxu1 %v1991_v30  ;;  %1026 = vmatprep.subr.mxu0 %v1586_v55 }
  0x44   :  { %1053 = vmatprep.subr.mxu1 %v1992_v28  ;;  %1027 = vmatpush3.msra.mxu0 %v1600_v37 }
  0x45   :  { %1054 = vmatpush3.msra.mxu1 %v1993_v13  ;;  %1028 = vmatprep.subr.mxu0 %v1620_v35 }
  0x46   :  { %1055 = vmatprep.subr.mxu1 %v1994_v48  ;;  %1029 = vmatpush3.msra.mxu0 %v1624_v31 }
  0x47   :  { %1056 = vmatpush3.msra.mxu1 %v1995_v23  ;;  %1030 = vmatprep.subr.mxu0 %v1641_v18 }
  0x48   :  { %1057 = vmatprep.subr.mxu1 %v1996_v62  ;;  %1031 = vmatpush3.msra.mxu0 %v1648_v6 }
  0x49   :  { %1058 = vmatpush3.msra.mxu1 %v1997_v3  ;;  %1032 = vmatprep.subr.mxu0 %v1660_v14 }
  0x4a   :  { %1059 = vmatprep.subr.mxu1 %v1998_v53  ;;  %1033 = vmatpush3.msra.mxu0 %v1671_v56  ;;  %v2004_v56 = vand.u32 4294901760, %v1217_v19  ;;  %v2011_v19 = vand.u32 4294901760, %v1288_v41  ;;  %v2017_v41 = vand.u32 4294901760, %v1368_v8  ;;  %v2032_v8 = vand.u32 4294901760, %v1620_v35  ;;  %v2046_v35 = vld [vmem:[#allocation16_spill] sm:$0xff] }
  0x4b   :  { %1060 = vmatpush3.msra.mxu1 %v1999_v29  ;;  %1034 = vmatprep.subr.mxu0 %v1686_v59  ;;  %v2005_v29 = vld [vmem:[#allocation18_spill] sm:$0xff]  ;;  %v2009_v59 = vld [vmem:[#allocation21_spill] sm:$0xff] }
  0x4c   :  { %1061 = vmatprep.subr.mxu1 %v2000_v63  ;;  %1035 = vmatpush3.msra.mxu0 %v1690_v44  ;;  %v2006_v63 = vand.u32 4294901760, %v1225_v21  ;;  %v2007_v44 = vld [vmem:[#allocation19_spill] sm:$0xff]  ;;  %v2012_v21 = vand.u32 4294901760, %v1304_v46  ;;  %v2018_v46 = vand.u32 4294901760, %v1382_v39  ;;  %v2034_v39 = vand.u32 4294901760, %v1641_v18 }
  0x4d   :  { %1062 = vmatpush3.msra.mxu1 %v1462_v0  ;;  %536 = vmatmul.mubr.f32.vlgmr.msra.gmra.mxu0 %v1634_v20  ;;  %v2008_v0 = vand.u32 4294901760, %v1261_v32  ;;  %v2013_v32 = vand.u32 4294901760, %v1631_v7  ;;  %v2045_v18 = vld [vmem:[#allocation23_spill] sm:$0xff] }
  0x4e   :  { %1063 = vmatprep.subr.mxu1 %v1479_v40  ;;  %1074 = vmatprep.subr.mxu0 %v2002_v51 }
  0x4f   :  { %1064 = vmatpush3.msra.mxu1 %v2003_v58  ;;  %1075 = vmatpush3.msra.mxu0 %v2004_v56 }
  0x50   :  { %1065 = vmatprep.subr.mxu1 %v2005_v29  ;;  %1076 = vmatprep.subr.mxu0 %v2006_v63  ;;  %v2016_v63 = vand.u32 4294901760, %v1354_v1  ;;  %v2020_v1 = vand.u32 4294901760, %v1411_v26 }
  0x51   :  { %1066 = vmatpush3.msra.mxu1 %v2007_v44  ;;  %1077 = vmatpush3.msra.mxu0 %v2008_v0  ;;  %v2014_v0 = vand.u32 4294901760, %v1339_v60  ;;  %v2019_v60 = vand.u32 4294901760, %v1394_v49  ;;  %v2036_v49 = vand.u32 4294901760, %v1660_v14 }
  0x52   :  { %1067 = vmatprep.subr.mxu1 %v2009_v59  ;;  %1078 = vmatprep.subr.mxu0 %v2010_v57 }
  0x53   :  { %1068 = vmatpush3.msra.mxu1 %v1557_v61  ;;  %1079 = vmatpush3.msra.mxu0 %v2011_v19 }
  0x54   :  { %1069 = vmatprep.subr.mxu1 %v1574_v50  ;;  %1080 = vmatprep.subr.mxu0 %v2012_v21 }
  0x55   :  { %1070 = vmatpush3.msra.mxu1 %v1596_v2  ;;  %640 = vmatprep.mubr.f32.mxu1 %v2013_v32 }
  0x56   :  { %1081 = vmatpush3.msra.mxu0 %v2014_v0  ;;  %644 = vmatmul.mubr.f32.vlgmr.msra.gmra.mxu1 %v2015_v36 }
  0x57   :  { %1082 = vmatprep.subr.mxu0 %v2016_v63  ;;  %1109 = vmatprep.subr.mxu1 %v1190_v9  ;;  %v2021_v9 = vand.u32 4294901760, %v1423_v38  ;;  %v2033_v38 = vand.u32 4294901760, %v1624_v31  ;;  %v2047_v31 = vld [vmem:[#allocation24_spill] sm:$0xff] }
  0x58   :  { %1083 = vmatpush3.msra.mxu0 %v2017_v41  ;;  %1110 = vmatpush3.msra.mxu1 %v1177_v4  ;;  %v2022_v4 = vand.u32 4294901760, %v1450_v54  ;;  %v2037_v54 = vld [vmem:[#allocation25_spill] sm:$0xff] }
  0x59   :  { %1084 = vmatprep.subr.mxu0 %v2018_v46  ;;  %1111 = vmatprep.subr.mxu1 %v1179_v5  ;;  %v2023_v5 = vand.u32 4294901760, %v1466_v33  ;;  %v2038_v26 = vand.u32 4294901760, %v2037_v54  ;;  %v2039_v33 = vld [vmem:[#allocation14_spill] sm:$0xff] }
  0x5a   :  { %1085 = vmatpush3.msra.mxu0 %v2019_v60  ;;  %1112 = vmatpush3.msra.mxu1 %v1192_v10  ;;  %v2024_v10 = vand.u32 4294901760, %v1490_v17 }
  0x5b   :  { %1086 = vmatprep.subr.mxu0 %v2020_v1  ;;  %1113 = vmatprep.subr.mxu1 %v1194_v11  ;;  %v2025_v11 = vand.u32 4294901760, %v1506_v47  ;;  %v2042_v47 = vld [vmem:[#allocation15_spill] sm:$0xff] }
  0x5c   :  { %1087 = vmatpush3.msra.mxu0 %v2021_v9  ;;  %1114 = vmatpush3.msra.mxu1 %v1196_v12  ;;  %v2026_v12 = vand.u32 4294901760, %v1518_v43  ;;  %v2043_v43 = vld [vmem:[#allocation27_spill] sm:$0xff] }
  0x5d   :  { %1088 = vmatprep.subr.mxu0 %v2022_v4  ;;  %1115 = vmatprep.subr.mxu1 %v1204_v15  ;;  %v2027_v15 = vand.u32 4294901760, %v1987_v27 }
  0x5e   :  { %1089 = vmatpush3.msra.mxu0 %v2023_v5  ;;  %1116 = vmatpush3.msra.mxu1 %v1206_v16  ;;  %v2028_v16 = vand.u32 4294901760, %v1989_v52 }
  0x5f   :  { %1090 = vmatprep.subr.mxu0 %v2024_v10  ;;  %1117 = vmatprep.subr.mxu1 %v1228_v22  ;;  %v2029_v22 = vand.u32 4294901760, %v1561_v34  ;;  %v2044_v34 = vand.u32 4294901760, %v2043_v43 }
  0x60   :  { %1091 = vmatpush3.msra.mxu0 %v2025_v11  ;;  %1118 = vmatpush3.msra.mxu1 %v1234_v24  ;;  %v2030_v24 = vand.u32 4294901760, %v1586_v55  ;;  %v2040_v55 = vld [vmem:[#allocation26_spill] sm:$0xff] }
  0x61   :  { %1092 = vmatprep.subr.mxu0 %v2026_v12  ;;  %1119 = vmatprep.subr.mxu1 %v1237_v25  ;;  %v2031_v25 = vand.u32 4294901760, %v1600_v37  ;;  %v2035_v37 = vand.u32 4294901760, %v1648_v6  ;;  %v2041_v17 = vand.u32 4294901760, %v2040_v55  ;;  %v50_v6 = vstv %s1881_s2 }
  0x62   :  { %1093 = vmatpush3.msra.mxu0 %v2027_v15  ;;  %1120 = vmatpush3.msra.mxu1 %v1988_v45 }
  0x63   :  { %1094 = vmatprep.subr.mxu0 %v2028_v16  ;;  %1121 = vmatprep.subr.mxu1 %v1990_v42 }
  0x64   :  { %1095 = vmatpush3.msra.mxu0 %v2029_v22  ;;  %1122 = vmatpush3.msra.mxu1 %v1991_v30 }
  0x65   :  { %1096 = vmatprep.subr.mxu0 %v2030_v24  ;;  %1123 = vmatprep.subr.mxu1 %v1992_v28 }
  0x66   :  { %1097 = vmatpush3.msra.mxu0 %v2031_v25  ;;  %1124 = vmatpush3.msra.mxu1 %v1993_v13 }
  0x67   :  { %1098 = vmatprep.subr.mxu0 %v2032_v8  ;;  %1125 = vmatprep.subr.mxu1 %v1994_v48 }
  0x68   :  { %1099 = vmatpush3.msra.mxu0 %v2033_v38  ;;  %1126 = vmatpush3.msra.mxu1 %v1995_v23 }
  0x69   :  { %1100 = vmatprep.subr.mxu0 %v2034_v39  ;;  %1127 = vmatprep.subr.mxu1 %v1996_v62 }
  0x6a   :  { %1101 = vmatpush3.msra.mxu0 %v2035_v37  ;;  %1128 = vmatpush3.msra.mxu1 %v1997_v3 }
  0x6b   :  { %1102 = vmatprep.subr.mxu0 %v2036_v49  ;;  %1129 = vmatprep.subr.mxu1 %v1998_v53 }
  0x6c   :  { %1103 = vmatpush3.msra.mxu0 %v2038_v26  ;;  %1130 = vmatpush3.msra.mxu1 %v2039_v33 }
  0x6d   :  { %1104 = vmatprep.subr.mxu0 %v2041_v17  ;;  %1131 = vmatprep.subr.mxu1 %v2042_v47 }
  0x6e   :  { %1105 = vmatpush3.msra.mxu0 %v2044_v34  ;;  %810 = vmatprep.mubr.f32.mxu0 %v2045_v18 }
  0x6f   :  { %1132 = vmatpush3.msra.mxu1 %v2046_v35  ;;  %812 = vmatmul.mubr.f32.vlgmr.msra.gmra.mxu0 %v2047_v31 }
  0x70   :  { %1133 = vmatprep.subr.mxu1 %v1479_v40  ;;  %914 = vmatprep.mubr.f32.mxu1 %v2045_v18 }
  0x71   :  { %1134 = vmatpush3.msra.mxu1 %v2003_v58 }
  0x72   :  { %1135 = vmatprep.subr.mxu1 %v2005_v29 }
  0x73   :  { %1136 = vmatpush3.msra.mxu1 %v2007_v44 }
  0x74   :  { %1137 = vmatprep.subr.mxu1 %v2009_v59 }
  0x75   :  { %1138 = vmatpush3.msra.mxu1 %v1557_v61 }
  0x76   :  { %1139 = vmatprep.subr.mxu1 %v1574_v50 }
  0x77   :  { %1140 = vmatpush3.msra.mxu1 %v1596_v2 }
  0x78   :  { %916 = vmatmul.mubr.f32.vlgmr.msra.gmra.mxu1 %v2047_v31 }
  0xed   :  { %v966_v7 = vpop.f32.mrf.mxu0 }
  0xef   :  { %v967_v40 = vpop.f32.mrf.mxu0 }
  0xf0   :  { %v968_v58 = vadd.f32 %v967_v40, %v966_v7 }
  0xf2   :  { %v168_v61 = vadd.f32 %v968_v58, %v50_v6 }
  0xf5   :  { %v1001_v20 = vpop.f32.mrf.mxu1 }
  0xf7   :  { %v1002_v56 = vpop.f32.mrf.mxu1 }
  0xf8   :  { %v1003_v29 = vadd.f32 %v1002_v56, %v1001_v20 }
  0xfa   :  { %v400_v27 = vadd.f32 %v1003_v29, %v168_v61 }
 0x10d   :  { %v1036_v51 = vpop.f32.mrf.mxu0 }
 0x10f   :  { %v1037_v14 = vpop.f32.mrf.mxu0 }
 0x110   :  { %v1038_v53 = vadd.f32 %v1037_v14, %v1036_v51 }
 0x112   :  { %v538_v52 = vadd.f32 %v1038_v53, %v400_v27 }
 0x116   :  { %v1071_v59 = vpop.f32.mrf.mxu1 }
 0x118   :  { %v1072_v50 = vpop.f32.mrf.mxu1 }
 0x119   :  { %v1073_v45 = vadd.f32 %v1072_v50, %v1071_v59 }
 0x11b   :  { %v646_v28 = vadd.f32 %v1073_v45, %v538_v52 }
 0x12f   :  { %v1106_v44 = vpop.f32.mrf.mxu0 }
 0x131   :  { %v1107_v2 = vpop.f32.mrf.mxu0 }
 0x132   :  { %v1108_v42 = vadd.f32 %v1107_v2, %v1106_v44 }
 0x134   :  { %v814_v48 = vadd.f32 %v1108_v42, %v646_v28 }
 0x138   :  { %v1141_v30 = vpop.f32.mrf.mxu1 }
 0x13a   :  { %v1142_v13 = vpop.f32.mrf.mxu1 }
 0x13b   :  { %v1143_v23 = vadd.f32 %v1142_v13, %v1141_v30 }
 0x13d   :  { %v918_v62 = vadd.f32 %v1143_v23, %v814_v48 }
 0x13f   :  { %v933_v3 = vmul.f32 -1.442695, %v918_v62 }
 0x141   :  { %1144 = vpow2.f32 %v933_v3 }
 0x14e   :  { %v1145_v57 = vpop.eup %1144 }
 0x14f   :  { %v924_v19 = vadd.f32 1.0, %v1145_v57 }
 0x151   :  { %1146 = vrcp.f32 %v924_v19 }
 0x15e   :  { %v1147_v21 = vpop.eup %1146 }
 0x15f   :  { %928 = vst.msk [vmem:[%s1882_s3] sm:$0xff] %vm927_vm2, %v1147_v21 }

</bundles_post_ra>
